<compile_context>
chip_gen: v7x
topology: tpu7x:2x2x1
jax: 0.10.0
libtpu: 0.0.40
codegen_flags: <defaults>
</compile_context>

<pallas_src>
import jax
import jax.numpy as jnp
from jax.experimental import pallas as pl
from jax.experimental.pallas import tpu as pltpu


def _round_up(x: int, m: int) -> int:
    return ((x + m - 1) // m) * m


def _largest_divisor_tile(extent: int, unit: int, max_tile: int) -> int:
    """Largest multiple of `unit` that divides `extent` exactly and is <= max_tile.

    Requires extent % unit == 0.  Trace-time only (cheap Python loop).
    """
    units_total = extent // unit
    max_units = max(1, min(max_tile, extent) // unit)
    for u in range(max_units, 0, -1):
        if units_total % u == 0:
            return u * unit
    return unit


def _plan_tiles(bs: int, vocab: int, elem_bytes: int,
                max_tile_bytes: int, target_tile_v: int):
    """Choose output extents + tile sizes.

    Returns (bs_out, v_out, tile_bs, tile_v, needs_slice).
    Preferred plan emits the output at its exact (bs, vocab) shape so the final
    reshape is metadata-only and no slice-copy is materialized.
    """
    def plan(bs_ext: int, v_ext: int):
        if v_ext % 128 == 0:
            tv = _largest_divisor_tile(v_ext, 128, target_tile_v)   # lane-dense, unmasked vst
        else:
            tv = v_ext                                               # full-extent block: masked vst, zero waste
        rows_budget = max(8, (max_tile_bytes // (tv * elem_bytes)) // 8 * 8)
        if bs_ext % 8 == 0:
            tb = _largest_divisor_tile(bs_ext, 8, rows_budget)
        else:
            tb = bs_ext                                              # full-extent block on sublane axis
        return tb, tv

    # Exact-shape attempt: no padded writes, no wrapper slice.
    tb, tv = plan(bs, vocab)
    if tb * tv * elem_bytes <= 2 * max_tile_bytes:
        return bs, vocab, tb, tv, False

    # Fallback (axis both misaligned AND too large to hold as one block):
    # pad only to (8, 128) granularity and slice afterwards.
    bs_pad, v_pad = _round_up(bs, 8), _round_up(vocab, 128)
    tb, tv = plan(bs_pad, v_pad)
    return bs_pad, v_pad, tb, tv, (bs_pad != bs or v_pad != vocab)


def _onehot_kernel(idx_ref, out_ref):
    """Write one one-hot tile of the (BS, V) output.

    idx_ref: SMEM (1,) int32  -- target class index (scalar prefetch)
    out_ref: VMEM (tile_bs, tile_v) float32
    """
    tile_bs, tile_v = out_ref.shape
    j = pl.program_id(1)  # vocab-tile index
    # Lane iota for this vocab tile, offset to global class ids.  Kept (1, tile_v)
    # so the int32 compare stays one sublane wide; broadcast happens at the store.
    lane = jax.lax.broadcasted_iota(jnp.int32, (1, tile_v), 1) + j * tile_v
    row = (lane == idx_ref[0]).astype(jnp.float32)            # (1, tile_v)
    out_ref[...] = jnp.broadcast_to(row, (tile_bs, tile_v))


def simple_model_forward(
    inputs: jax.Array,
    output_index,
    vocab_size: int,
    *,
    max_tile_bytes: int = 4 * 1024 * 1024,   # ~4 MiB per output block (x2 buffered)
    target_tile_v: int = 2048,
) -> jax.Array:
    """JAX/Pallas equivalent of SimpleModel.forward.

    Args:
        inputs: (batch, seq) integer token indices (values unused, as in torch.fill).
        output_index: scalar int (Python int or 0-d array) -- the class to one-hot.
        vocab_size: number of classes.
    Returns:
        (batch, seq, vocab_size) float32 one-hot "logits".
    """
    batch, seq = inputs.shape
    bs = batch * seq
    elem = 4  # float32 bytes

    bs_out, v_out, tile_bs, tile_v, needs_slice = _plan_tiles(
        bs, vocab_size, elem, max_tile_bytes, target_tile_v)
    grid = (bs_out // tile_bs, v_out // tile_v)

    # Runtime scalar -> SMEM via scalar prefetch (no recompile per distinct index).
    idx = jnp.asarray(output_index, dtype=jnp.int32).reshape((1,))

    # Only raise the scoped-VMEM limit if the requested tiles actually need it
    # (default 4 MiB tiles x2 buffers stay under every chip's default budget).
    tile_bytes = tile_bs * tile_v * elem
    vmem_limit = None
    if 2 * tile_bytes > 14 * 1024 * 1024:
        vmem_limit = min(2 * tile_bytes + (2 << 20), 128 * 1024 * 1024)

    out = pl.pallas_call(
        _onehot_kernel,
        out_shape=jax.ShapeDtypeStruct((bs_out, v_out), jnp.float32),
        grid_spec=pltpu.PrefetchScalarGridSpec(
            num_scalar_prefetch=1,
            grid=grid,
            in_specs=[],  # no tensor inputs: pure constant broadcast
            out_specs=pl.BlockSpec((tile_bs, tile_v), lambda i, j, idx_ref: (i, j)),
        ),
        compiler_params=pltpu.CompilerParams(
            dimension_semantics=("parallel", "parallel"),
            vmem_limit_bytes=vmem_limit,
        ),
    )(idx)

    if needs_slice:
        # Fallback path only: padded rows/classes are zeros and sliced off.
        out = out[:bs, :vocab_size]

    # TODO(synk): torch.nn.functional.one_hot raises for output_index >= vocab_size
    # (or negative); this version silently yields an all-zeros row in that case.
    return out.reshape(batch, seq, vocab_size)


if __name__ == "__main__":
    key = jax.random.PRNGKey(0)

    # Small shapes consistent with the module's forward.
    batch, seq, vocab_size = 2, 8, 32
    output_index = 5
    inputs = jax.random.randint(
        key, (batch, seq), minval=0, maxval=vocab_size, dtype=jnp.int32
    )

    out = jax.block_until_ready(simple_model_forward(inputs, output_index, vocab_size))
    ref = jax.nn.one_hot(
        jnp.full((batch, seq), output_index, dtype=jnp.int32),
        vocab_size, dtype=jnp.float32,
    )
    assert out.shape == (batch, seq, vocab_size)
    assert out.dtype == jnp.float32
    assert bool(jnp.all(out == ref))

    # Different runtime index -> same compiled kernel (scalar prefetch, no recompile).
    out2 = jax.block_until_ready(simple_model_forward(inputs, 17, vocab_size))
    ref2 = jax.nn.one_hot(
        jnp.full((batch, seq), 17, dtype=jnp.int32), vocab_size, dtype=jnp.float32
    )
    assert bool(jnp.all(out2 == ref2))

    # Aligned path (vocab % 128 == 0, batch*seq % 8 == 0): exact-shape, lane-dense tiles.
    b2, s2, v2 = 4, 32, 256
    inp2 = jax.random.randint(
        jax.random.PRNGKey(1), (b2, s2), minval=0, maxval=v2, dtype=jnp.int32
    )
    out3 = jax.block_until_ready(simple_model_forward(inp2, 200, v2))
    ref3 = jax.nn.one_hot(
        jnp.full((b2, s2), 200, dtype=jnp.int32), v2, dtype=jnp.float32
    )
    assert bool(jnp.all(out3 == ref3))

    print("KERNEL_OK")
</pallas_src>

<mosaic_0001>
module attributes {stable_mosaic.version = 11 : i64} {
  func.func @_onehot_kernel(%arg0: i32, %arg1: i32, %arg2: memref<1xi32, #tpu.memory_space<smem>>, %arg3: memref<16x32xf32, #tpu.memory_space<vmem>>) attributes {dimension_semantics = [#tpu.dimension_semantics<parallel>, #tpu.dimension_semantics<parallel>], iteration_bounds = array<i64: 1, 1>, scalar_prefetch = 1 : i64, scratch_operands = 0 : i64, tpu.core_type = #tpu.core_type<tc>, window_params = [{transform_indices = @transform_0, window_bounds = array<i64: 16, 32>}]} {
    %0 = tpu.iota {dimensions = array<i32: 1>} : vector<1x32xi32>
    %c32_i32 = arith.constant 32 : i32
    %1 = arith.muli %arg1, %c32_i32 : i32
    %2 = vector.broadcast %1 : i32 to vector<1x32xi32>
    %3 = arith.addi %0, %2 : vector<1x32xi32>
    %c0 = arith.constant 0 : index
    %4 = memref.load %arg2[%c0] : memref<1xi32, #tpu.memory_space<smem>>
    %5 = vector.broadcast %4 : i32 to vector<1x32xi32>
    %6 = arith.cmpi eq, %3, %5 : vector<1x32xi32>
    %7 = arith.extui %6 : vector<1x32xi1> to vector<1x32xi32>
    %8 = arith.sitofp %7 : vector<1x32xi32> to vector<1x32xf32>
    %9 = vector.shape_cast %8 : vector<1x32xf32> to vector<1x32xf32>
    %10 = vector.broadcast %9 : vector<1x32xf32> to vector<16x32xf32>
    %c0_0 = arith.constant 0 : index
    %c0_1 = arith.constant 0 : index
    %11 = vector.load %arg3[%c0_0, %c0_1] : memref<16x32xf32, #tpu.memory_space<vmem>>, vector<16x32xf32>
    tpu.vector_store %arg3[%c0_0, %c0_1], %10 {strides = array<i32>} : memref<16x32xf32, #tpu.memory_space<vmem>>, vector<16x32xf32>,
    return
  }
  func.func @transform_0(%arg0: i32, %arg1: i32, %arg2: memref<1xi32, #tpu.memory_space<smem>>) -> (i32, i32) {
    %c0_i32 = arith.constant 0 : i32
    return %arg0, %arg1 : i32, i32
  }
}

</mosaic_0001>

<bundles_post_ra>
// kernel: tpu_custom_call.1
= control target key start
LH: loop header
LB: loop body
LE: loop exit
PB: predicated region body
PF: predicated region fallthrough
CT: control target
= control target key end

     0   :  { %v8_v0 = vlaneseq  ;;  %s95_s0 = inlined_call_operand.<no memory space> [shape: s32[1], index: 0, kind: input, shape index: {}]   ;;  %s96_s1 = inlined_call_operand.hbm [shape: f32[16,32], index: 1, kind: output, shape index: {}]  }
   0x1   :  { %7 = vsyncpa [#allocation5], 0  ;;  %v14_v1 = vstv %s95_s0  ;;  %s66_s8 = smov [#allocation4]   ;;  %vm18_vm0 = vcmask 261120   ;;  %v67_v3 = vmov 0.0  }
   0x2   :  { %s26_s9 = sshll.u32 %s66_s8, 4  ;;  %v9_v2 = vand.u32 127, %v8_v0  ;;  %s27_s9 = int_to_ptr.vmem [resolvable:$true] %s26_s9 }
   0x3   :  { %s42_s10 = scalar_lea.vmem %s27_s9, 256  ;;  %p47_p1 = scmp.lt.s32.totalorder %s27_s9, %s27_s9 }
   0x4   :  { %vm15_vm1 = vcmp.eq.s32.totalorder %v9_v2, %v14_v1  ;;  %p43_p0 = scmp.ne.s32.totalorder %s27_s9, %s42_s10  ;;  %p48_p2 = scmp.lt.s32.totalorder %s42_s10, %s42_s10 }
   0x5   :  { %v37_v4 = vsel %vm15_vm1, 1.0, %v67_v3 }
   0x6   :  { %19 = vst.msk [vmem:[#allocation4] sm:$0xff] %vm18_vm0, %v37_v4  ;;  %20 = vst.msk [vmem:[#allocation4 + $0x8] sm:$0xff] %vm18_vm0, %v37_v4  ;;  %p49_p3 = por %p48_p2, %p47_p1 }
   0x8   :  { %p50_p4 = pnand %p49_p3, %p43_p0 }
   0xa   :  { %53 = shalt.err (!%p50_p4)
}
   0xb   :  { %s54_s0 = scalar_lea.hbm %s96_s1, 256 }
   0xc   :  { %p55_p5 = scmp.ne.s32.totalorder %s96_s1, %s54_s0  ;;  %p58_p6 = scmp.lt.u32.totalorder %s54_s0, %s96_s1 }
   0xe   :  { %p60_p7 = pnand %p58_p6, %p55_p5 }
  0x10   :  { %63 = shalt.err (!%p60_p7)
}
  0x11   :  { %s68_s17 = smov 128   ;;  %s69_s18 = smov 8  }
  0x12   :  { %32 = dma.vmem_to_hbm [thread:$0]  %s27_s9, 256, %s96_s1, [#allocation5], %s68_s17, %s68_s17, %s69_s18  }
  0x13   :  { %64 = dma.done.wait [#allocation5], 256  }
  0x14   :  { %65 = vsyncadd [#allocation5], 4294967040 }
  0x15   :  { %36 = vsyncpa [#allocation5], 1 }

</bundles_post_ra>
